<compile_context>
chip_gen: v5e
topology: v5e:2x2
jax: 0.10.0
libtpu: 0.0.40
codegen_flags: <defaults>
</compile_context>

<pallas_src>
import functools

import jax
import jax.numpy as jnp
from jax.experimental import pallas as pl
from jax.experimental.pallas import tpu as pltpu

BN_EPS = 1e-3
ACT_DTYPE = jnp.bfloat16          # inter-layer activation storage dtype


def _vmem_limit():
    # ~half of physical VMEM per TensorCore (64 MiB on v5e/v6e, 32 MiB on v7x).
    try:
        cap = int(pltpu.get_tpu_info().vmem_capacity_bytes)
        return max(32 * 1024 * 1024, min(cap // 2, 96 * 1024 * 1024))
    except Exception:
        return 32 * 1024 * 1024


VMEM_LIMIT = _vmem_limit()

# EfficientNetV2-S stage config: (type, expand, kernel, stride, cin, cout, layers)
STAGE_CFG = [
    ("fused", 1, 3, 1, 24, 24, 2),     # features[1]
    ("fused", 4, 3, 2, 24, 48, 4),     # features[2]
    ("fused", 4, 3, 2, 48, 64, 4),     # features[3]
    ("mb",    4, 3, 2, 64, 128, 6),    # features[4]
    ("mb",    6, 3, 1, 128, 160, 9),   # features[5]
    ("mb",    6, 3, 2, 160, 256, 15),  # features[6]
]


def _block_cfgs():
    cfgs = []
    for (btype, e, k, s, cin, cout, n_layers) in STAGE_CFG:
        stage = []
        for i in range(n_layers):
            bcin = cin if i == 0 else cout
            stage.append(dict(type=btype, expand=e, kernel=k,
                              stride=s if i == 0 else 1,
                              cin=bcin, cout=cout,
                              expanded=bcin * e, sq=max(1, bcin // 4)))
        cfgs.append(stage)
    return cfgs


BLOCK_CFGS = _block_cfgs()


# -----------------------------------------------------------------------------
# Pallas kernels
# -----------------------------------------------------------------------------

def _norm_kernel(x_ref, m_ref, s_ref, o_ref):
    # torchvision Normalize on a lane-dense layout: rows = (n, c), lanes = H*W.
    o_ref[...] = (x_ref[...] - m_ref[...]) * s_ref[...]


def _mm_kernel(x_ref, w_ref, s_ref, b_ref, *rest, act, has_proj):
    # conv-as-matmul (stem / stride-2 im2col convs / 1x1 expands) + folded BN
    # (+ SiLU) (+ fused 1x1 project conv + BN).  bf16 MXU inputs, f32 epilogue.
    if has_proj:
        w2_ref, s2_ref, b2_ref, o_ref = rest
    else:
        (o_ref,) = rest
    y = jnp.dot(x_ref[...], w_ref[...], preferred_element_type=jnp.float32)
    y = y * s_ref[...] + b_ref[...]
    if act:
        y = y * jax.nn.sigmoid(y)                       # SiLU
    if has_proj:
        y = jnp.dot(y.astype(jnp.bfloat16), w2_ref[...],
                    preferred_element_type=jnp.float32)
        y = y * s2_ref[...] + b2_ref[...]
    o_ref[...] = y.astype(o_ref.dtype)


def _fused_block_s1_kernel(x_ref, w3_ref, s3_ref, b3_ref, *rest,
                           H, W, has_proj, has_res):
    # One whole stride-1 FusedMBConv block:
    #   3x3 conv (in-VMEM halo padding, 9 per-tap MXU matmuls) + BN + SiLU
    #   [+ 1x1 project + BN] + residual, clean NHWC in / out (no HBM glue).
    if has_proj:
        wp_ref, sp_ref, bp_ref, o_ref, pad = rest
    else:
        o_ref, pad = rest
    wp = W + 2
    mp = (H - 1) * wp + W
    x = x_ref[0]                                        # [H*W, Cin] bf16

    # Scatter the clean input into a zero-padded, row-flattened VMEM scratch.
    pad[...] = jnp.zeros_like(pad)
    for r in range(H):
        pad[(r + 1) * wp + 1:(r + 1) * wp + 1 + W, :] = (
            x[r * W:(r + 1) * W, :].astype(jnp.float32))

    acc = None
    for kh in range(3):
        for kw in range(3):
            tap = pad[kh * wp + kw: kh * wp + kw + mp, :].astype(jnp.bfloat16)
            part = jnp.dot(tap, w3_ref[kh * 3 + kw],
                           preferred_element_type=jnp.float32)
            acc = part if acc is None else acc + part
    h = acc * s3_ref[...] + b3_ref[...]
    h = h * jax.nn.sigmoid(h)                           # SiLU
    if has_proj:
        y = jnp.dot(h.astype(jnp.bfloat16), wp_ref[...],
                    preferred_element_type=jnp.float32)
        y = y * sp_ref[...] + bp_ref[...]
    else:
        y = h

    # De-wrap (drop the invalid wrap columns) + fused residual, bf16 store.
    for r in range(H):
        row = y[r * wp: r * wp + W, :]
        if has_res:
            row = row + x[r * W:(r + 1) * W, :].astype(jnp.float32)
        o_ref[0, r * W:(r + 1) * W, :] = row.astype(o_ref.dtype)


def _mb_block_s1_kernel(x_ref, we_ref, se_ref, be_ref,
                        wdw_ref, sdw_ref, bdw_ref,
                        w1_ref, b1_ref, w2_ref, b2_ref,
                        wpj_ref, spj_ref, bpj_ref, vmask_ref,
                        o_ref, pad, *, H, W, inv_hw, has_res):
    # One whole stride-1 MBConv block:
    #   1x1 expand + BN + SiLU -> dw 3x3 (in-VMEM halo) + BN + SiLU -> SE
    #   -> 1x1 project + BN -> residual.  Expanded activation never hits HBM.
    wp = W + 2
    mp = (H - 1) * wp + W
    x = x_ref[0]                                        # [H*W, Cin] bf16

    h = jnp.dot(x, we_ref[...], preferred_element_type=jnp.float32)
    h = h * se_ref[...] + be_ref[...]
    h = h * jax.nn.sigmoid(h)                           # [H*W, Ce]

    pad[...] = jnp.zeros_like(pad)
    for r in range(H):
        pad[(r + 1) * wp + 1:(r + 1) * wp + 1 + W, :] = h[r * W:(r + 1) * W, :]

    acc = None
    for kh in range(3):
        for kw in range(3):
            t = pad[kh * wp + kw: kh * wp + kw + mp, :] * wdw_ref[kh * 3 + kw]
            acc = t if acc is None else acc + t
    y = acc * sdw_ref[...] + bdw_ref[...]
    y = y * jax.nn.sigmoid(y)                           # [mp, Ce]

    # SE squeeze over valid positions only (wrap columns are garbage).
    s = jnp.sum(y * vmask_ref[...], axis=0, keepdims=True) * inv_hw
    z = jnp.dot(s, w1_ref[...], preferred_element_type=jnp.float32) + b1_ref[...]
    z = z * jax.nn.sigmoid(z)                           # SiLU
    g = jax.nn.sigmoid(
        jnp.dot(z, w2_ref[...], preferred_element_type=jnp.float32) + b2_ref[...])

    yg = (y * g).astype(jnp.bfloat16)
    out = jnp.dot(yg, wpj_ref[...], preferred_element_type=jnp.float32)
    out = out * spj_ref[...] + bpj_ref[...]

    for r in range(H):
        row = out[r * wp: r * wp + W, :]
        if has_res:
            row = row + x[r * W:(r + 1) * W, :].astype(jnp.float32)
        o_ref[0, r * W:(r + 1) * W, :] = row.astype(o_ref.dtype)


def _mb_tail_s2_kernel(p_ref, wdw_ref, sdw_ref, bdw_ref,
                       w1_ref, b1_ref, w2_ref, b2_ref,
                       wpj_ref, spj_ref, bpj_ref, o_ref, *, inv_hw):
    # Stride-2 MBConv tail: dw 3x3 (pre-extracted taps) + BN + SiLU + SE +
    # 1x1 project + BN in one kernel.
    p = p_ref[0]                                        # [9, OHW, Ce] bf16
    acc = None
    for k in range(9):
        t = p[k] * wdw_ref[k]
        acc = t if acc is None else acc + t
    y = acc * sdw_ref[...] + bdw_ref[...]
    y = y * jax.nn.sigmoid(y)
    s = jnp.sum(y, axis=0, keepdims=True) * inv_hw
    z = jnp.dot(s, w1_ref[...], preferred_element_type=jnp.float32) + b1_ref[...]
    z = z * jax.nn.sigmoid(z)
    g = jax.nn.sigmoid(
        jnp.dot(z, w2_ref[...], preferred_element_type=jnp.float32) + b2_ref[...])
    yg = (y * g).astype(jnp.bfloat16)
    out = jnp.dot(yg, wpj_ref[...], preferred_element_type=jnp.float32)
    o_ref[0] = (out * spj_ref[...] + bpj_ref[...]).astype(o_ref.dtype)


# -----------------------------------------------------------------------------
# Pallas wrappers
# -----------------------------------------------------------------------------

def _cparams(*sem):
    return pltpu.CompilerParams(dimension_semantics=tuple(sem),
                                vmem_limit_bytes=VMEM_LIMIT)


def _pick_bm(m):
    for bm in (1024, 512, 256, 128, 64, 32, 16, 8):
        if m % bm == 0:
            return bm
    return m        # tiny / odd M: whole-M block (fine at these sizes)


def normalize_input_nchw(x_nchw):
    n, c, h, w = x_nchw.shape
    xm = x_nchw.reshape(n * c, h * w)                  # lane-dense: H*W on lanes
    mean = jnp.tile(jnp.array([0.485, 0.456, 0.406], jnp.float32).reshape(c, 1),
                    (n, 1))
    inv_std = jnp.tile(jnp.array([1.0 / 0.229, 1.0 / 0.224, 1.0 / 0.225],
                                 jnp.float32).reshape(c, 1), (n, 1))
    out = pl.pallas_call(
        _norm_kernel,
        out_shape=jax.ShapeDtypeStruct((n * c, h * w), jnp.float32),
        in_specs=[pl.BlockSpec(memory_space=pltpu.MemorySpace.VMEM)] * 3,
        out_specs=pl.BlockSpec(memory_space=pltpu.MemorySpace.VMEM),
        compiler_params=pltpu.CompilerParams(vmem_limit_bytes=VMEM_LIMIT),
    )(xm, mean, inv_std)
    return out.reshape(n, c, h, w)


def _matmul_conv(xm, p, act, proj=None):
    m, k = xm.shape
    c1 = p["w"].shape[-1]
    cout = c1 if proj is None else proj["w"].shape[-1]
    bm = _pick_bm(m)
    in_specs = [pl.BlockSpec((bm, k), lambda i: (i, 0)),
                pl.BlockSpec((k, c1), lambda i: (0, 0)),
                pl.BlockSpec((1, c1), lambda i: (0, 0)),
                pl.BlockSpec((1, c1), lambda i: (0, 0))]
    args = [xm, p["w"], p["scale"], p["bias"]]
    if proj is not None:
        in_specs += [pl.BlockSpec((c1, cout), lambda i: (0, 0)),
                     pl.BlockSpec((1, cout), lambda i: (0, 0)),
                     pl.BlockSpec((1, cout), lambda i: (0, 0))]
        args += [proj["w"], proj["scale"], proj["bias"]]
    kern = functools.partial(_mm_kernel, act=act, has_proj=proj is not None)
    flops = 2 * m * k * c1 + (2 * m * c1 * cout if proj is not None else 0)
    return pl.pallas_call(
        kern,
        out_shape=jax.ShapeDtypeStruct((m, cout), ACT_DTYPE),
        grid=(m // bm,),
        in_specs=in_specs,
        out_specs=pl.BlockSpec((bm, cout), lambda i: (i, 0)),
        compiler_params=_cparams("parallel"),
        cost_estimate=pl.CostEstimate(
            flops=flops,
            transcendentals=m * c1 if act else 0,
            bytes_accessed=2 * (m * k + k * c1 + m * cout)),
    )(*args)


def conv1x1(x, p, act):
    n, h, w, c = x.shape
    cout = p["w"].shape[-1]
    y = _matmul_conv(x.reshape(n * h * w, c), p, act)
    return y.reshape(n, h, w, cout)


def _extract_patches(x, k, stride, pad):
    # JAX-glue im2col; only used for the few stride-2 convs (stem + first block
    # of strided stages).  TODO(synk): move tap extraction in-kernel.
    n, h, w, c = x.shape
    xp = jnp.pad(x, ((0, 0), (pad, pad), (pad, pad), (0, 0)))
    oh = (h + 2 * pad - k) // stride + 1
    ow = (w + 2 * pad - k) // stride + 1
    cols = []
    for kh in range(k):
        for kw in range(k):
            cols.append(xp[:, kh:kh + (oh - 1) * stride + 1:stride,
                              kw:kw + (ow - 1) * stride + 1:stride, :])
    return jnp.stack(cols, axis=3), oh, ow             # [N, OH, OW, 9, C]


def conv3x3_im2col(x, p, stride, act, proj=None):
    n, h, w, c = x.shape
    cout = p["w"].shape[-1] if proj is None else proj["w"].shape[-1]
    patches, oh, ow = _extract_patches(x, 3, stride, 1)
    y = _matmul_conv(patches.reshape(n * oh * ow, 9 * c), p, act, proj=proj)
    return y.reshape(n, oh, ow, cout)


def fused_block_s1(x, p3, proj, has_res):
    # Whole stride-1 FusedMBConv block in one pallas_call.
    n, h, w, cin = x.shape
    ce = p3["w"].shape[-1]
    cout = ce if proj is None else proj["w"].shape[-1]
    wp = w + 2
    mp = (h - 1) * wp + w
    hw = h * w
    xm = x.reshape(n, hw, cin)
    in_specs = [pl.BlockSpec((1, hw, cin), lambda i: (i, 0, 0)),
                pl.BlockSpec((9, cin, ce), lambda i: (0, 0, 0)),
                pl.BlockSpec((1, ce), lambda i: (0, 0)),
                pl.BlockSpec((1, ce), lambda i: (0, 0))]
    args = [xm, p3["w"], p3["scale"], p3["bias"]]
    if proj is not None:
        in_specs += [pl.BlockSpec((ce, cout), lambda i: (0, 0)),
                     pl.BlockSpec((1, cout), lambda i: (0, 0)),
                     pl.BlockSpec((1, cout), lambda i: (0, 0))]
        args += [proj["w"], proj["scale"], proj["bias"]]
    kern = functools.partial(_fused_block_s1_kernel, H=h, W=w,
                             has_proj=proj is not None, has_res=has_res)
    flops = 2 * n * mp * 9 * cin * ce
    if proj is not None:
        flops += 2 * n * mp * ce * cout
    y = pl.pallas_call(
        kern,
        out_shape=jax.ShapeDtypeStruct((n, hw, cout), ACT_DTYPE),
        grid=(n,),
        in_specs=in_specs,
        out_specs=pl.BlockSpec((1, hw, cout), lambda i: (i, 0, 0)),
        scratch_shapes=[pltpu.VMEM(((h + 2) * wp, cin), jnp.float32)],
        compiler_params=_cparams("parallel"),
        cost_estimate=pl.CostEstimate(
            flops=flops,
            transcendentals=n * mp * ce,
            bytes_accessed=2 * n * hw * (cin + cout) + 2 * 9 * cin * ce),
    )(*args)
    return y.reshape(n, h, w, cout)


def mb_block_s1(x, bp, has_res):
    # Whole stride-1 MBConv block in one pallas_call.
    n, h, w, cin = x.shape
    ce = bp["expand"]["w"].shape[-1]
    cout = bp["project"]["w"].shape[-1]
    sq = bp["se"]["w1"].shape[-1]
    wp = w + 2
    mp = (h - 1) * wp + w
    hw = h * w
    vmask = ((jnp.arange(mp) % wp) < w).astype(jnp.float32).reshape(mp, 1)
    xm = x.reshape(n, hw, cin)
    in_specs = [
        pl.BlockSpec((1, hw, cin), lambda i: (i, 0, 0)),
        pl.BlockSpec((cin, ce), lambda i: (0, 0)),
        pl.BlockSpec((1, ce), lambda i: (0, 0)),
        pl.BlockSpec((1, ce), lambda i: (0, 0)),
        pl.BlockSpec((9, 1, ce), lambda i: (0, 0, 0)),
        pl.BlockSpec((1, ce), lambda i: (0, 0)),
        pl.BlockSpec((1, ce), lambda i: (0, 0)),
        pl.BlockSpec((ce, sq), lambda i: (0, 0)),
        pl.BlockSpec((1, sq), lambda i: (0, 0)),
        pl.BlockSpec((sq, ce), lambda i: (0, 0)),
        pl.BlockSpec((1, ce), lambda i: (0, 0)),
        pl.BlockSpec((ce, cout), lambda i: (0, 0)),
        pl.BlockSpec((1, cout), lambda i: (0, 0)),
        pl.BlockSpec((1, cout), lambda i: (0, 0)),
        pl.BlockSpec((mp, 1), lambda i: (0, 0)),
    ]
    args = [xm,
            bp["expand"]["w"], bp["expand"]["scale"], bp["expand"]["bias"],
            bp["dw"]["w"], bp["dw"]["scale"], bp["dw"]["bias"],
            bp["se"]["w1"], bp["se"]["b1"], bp["se"]["w2"], bp["se"]["b2"],
            bp["project"]["w"], bp["project"]["scale"], bp["project"]["bias"],
            vmask]
    kern = functools.partial(_mb_block_s1_kernel, H=h, W=w,
                             inv_hw=1.0 / float(hw), has_res=has_res)
    y = pl.pallas_call(
        kern,
        out_shape=jax.ShapeDtypeStruct((n, hw, cout), ACT_DTYPE),
        grid=(n,),
        in_specs=in_specs,
        out_specs=pl.BlockSpec((1, hw, cout), lambda i: (i, 0, 0)),
        scratch_shapes=[pltpu.VMEM(((h + 2) * wp, ce), jnp.float32)],
        compiler_params=_cparams("parallel"),
        cost_estimate=pl.CostEstimate(
            flops=2 * n * hw * cin * ce + 2 * n * mp * ce * cout
                  + 4 * n * ce * sq + 2 * n * mp * 9 * ce,
            transcendentals=n * (hw + mp) * ce,
            bytes_accessed=2 * n * hw * (cin + cout)
                           + 2 * ce * (cin + cout) + 4 * 9 * ce),
    )(*args)
    return y.reshape(n, h, w, cout)


def mb_block_s2(x, bp, stride):
    # Stride-2 MBConv: 1x1 expand (gridded matmul) + fused dw/SE/project tail.
    y = conv1x1(x, bp["expand"], act=True)
    n, h, w, ce = y.shape
    patches, oh, ow = _extract_patches(y, 3, stride, 1)
    pk = jnp.moveaxis(patches, 3, 1).reshape(n, 9, oh * ow, ce)
    cout = bp["project"]["w"].shape[-1]
    sq = bp["se"]["w1"].shape[-1]
    ohw = oh * ow
    in_specs = [pl.BlockSpec((1, 9, ohw, ce), lambda i: (i, 0, 0, 0)),
                pl.BlockSpec((9, 1, ce), lambda i: (0, 0, 0)),
                pl.BlockSpec((1, ce), lambda i: (0, 0)),
                pl.BlockSpec((1, ce), lambda i: (0, 0)),
                pl.BlockSpec((ce, sq), lambda i: (0, 0)),
                pl.BlockSpec((1, sq), lambda i: (0, 0)),
                pl.BlockSpec((sq, ce), lambda i: (0, 0)),
                pl.BlockSpec((1, ce), lambda i: (0, 0)),
                pl.BlockSpec((ce, cout), lambda i: (0, 0)),
                pl.BlockSpec((1, cout), lambda i: (0, 0)),
                pl.BlockSpec((1, cout), lambda i: (0, 0))]
    args = [pk, bp["dw"]["w"], bp["dw"]["scale"], bp["dw"]["bias"],
            bp["se"]["w1"], bp["se"]["b1"], bp["se"]["w2"], bp["se"]["b2"],
            bp["project"]["w"], bp["project"]["scale"], bp["project"]["bias"]]
    kern = functools.partial(_mb_tail_s2_kernel, inv_hw=1.0 / float(ohw))
    out = pl.pallas_call(
        kern,
        out_shape=jax.ShapeDtypeStruct((n, ohw, cout), ACT_DTYPE),
        grid=(n,),
        in_specs=in_specs,
        out_specs=pl.BlockSpec((1, ohw, cout), lambda i: (i, 0, 0)),
        compiler_params=_cparams("parallel"),
        cost_estimate=pl.CostEstimate(
            flops=2 * n * ohw * ce * cout + 4 * n * ce * sq + 2 * n * ohw * 9 * ce,
            transcendentals=n * ohw * ce,
            bytes_accessed=2 * n * 9 * ohw * ce + 2 * ce * cout
                           + 2 * n * ohw * cout),
    )(*args)
    return out.reshape(n, oh, ow, cout)


# -----------------------------------------------------------------------------
# Parameter construction (synthetic, deterministic)
# -----------------------------------------------------------------------------

class KeyGen:
    def __init__(self, key):
        self.key = key

    def __call__(self):
        self.key, sub = jax.random.split(self.key)
        return sub


def _bn_fold(kg, cout):
    gamma = jax.random.uniform(kg(), (cout,), jnp.float32, 0.5, 1.5)
    beta = jax.random.normal(kg(), (cout,), jnp.float32) * 0.1
    rmean = jax.random.normal(kg(), (cout,), jnp.float32) * 0.1
    rvar = jax.random.uniform(kg(), (cout,), jnp.float32, 0.5, 1.5)
    scale = gamma / jnp.sqrt(rvar + BN_EPS)            # eval-mode BN fold
    bias = beta - rmean * scale
    return scale.reshape(1, cout), bias.reshape(1, cout)


def _make_conv(kg, cin, cout, k, stride=1, depthwise=False):
    fan_in = k * k * (1 if depthwise else cin)
    wshape = (cout, 1, k, k) if depthwise else (cout, cin, k, k)
    w = jax.random.normal(kg(), wshape, jnp.float32) / jnp.sqrt(float(fan_in))
    scale, bias = _bn_fold(kg, cout)
    if depthwise:                                    # taps on the leading dim
        wk = jnp.transpose(w[:, 0], (1, 2, 0)).reshape(k * k, 1, cout)
        return {"w": wk, "scale": scale, "bias": bias}
    if k == 1:                                       # [Cin, Cout] matmul layout
        wm = w.reshape(cout, cin).T.astype(jnp.bfloat16)
    elif stride == 1:                                # [9, Cin, Cout] per-tap
        wm = jnp.transpose(w, (2, 3, 1, 0)).reshape(k * k, cin,
                                                    cout).astype(jnp.bfloat16)
    else:                                            # [9*Cin, Cout] im2col
        wm = jnp.transpose(w, (2, 3, 1, 0)).reshape(k * k * cin,
                                                    cout).astype(jnp.bfloat16)
    return {"w": wm, "scale": scale, "bias": bias}


def init_params(key):
    kg = KeyGen(key)
    params = {"stem": _make_conv(kg, 3, 24, 3, stride=2)}       # features[0]
    stages = []
    for stage_cfg in BLOCK_CFGS:
        blocks = []
        for cfg in stage_cfg:
            bp = {}
            if cfg["type"] == "fused":
                if cfg["expand"] == 1:
                    bp["fused"] = _make_conv(kg, cfg["cin"], cfg["cout"], 3,
                                             stride=cfg["stride"])
                else:
                    bp["expand"] = _make_conv(kg, cfg["cin"], cfg["expanded"], 3,
                                              stride=cfg["stride"])
                    bp["project"] = _make_conv(kg, cfg["expanded"], cfg["cout"], 1)
            else:
                ce, sq = cfg["expanded"], cfg["sq"]
                bp["expand"] = _make_conv(kg, cfg["cin"], ce, 1)
                bp["dw"] = _make_conv(kg, ce, ce, 3, stride=cfg["stride"],
                                      depthwise=True)
                bp["se"] = {
                    "w1": jax.random.normal(kg(), (ce, sq), jnp.float32)
                          / jnp.sqrt(float(ce)),
                    "b1": jax.random.normal(kg(), (1, sq), jnp.float32) * 0.1,
                    "w2": jax.random.normal(kg(), (sq, ce), jnp.float32)
                          / jnp.sqrt(float(sq)),
                    "b2": jax.random.normal(kg(), (1, ce), jnp.float32) * 0.1,
                }
                bp["project"] = _make_conv(kg, ce, cfg["cout"], 1)
            blocks.append(bp)
        stages.append(blocks)
    params["stages"] = stages
    return params


# -----------------------------------------------------------------------------
# Forward pass (mirrors EfficientNetV2Encoder.forward)
# -----------------------------------------------------------------------------

def _run_block(x, cfg, bp):
    has_res = cfg["stride"] == 1 and cfg["cin"] == cfg["cout"]
    if cfg["type"] == "fused":
        if cfg["stride"] == 1:
            if cfg["expand"] == 1:
                return fused_block_s1(x, bp["fused"], None, has_res)
            return fused_block_s1(x, bp["expand"], bp["project"], has_res)
        if cfg["expand"] == 1:
            return conv3x3_im2col(x, bp["fused"], cfg["stride"], act=True)
        return conv3x3_im2col(x, bp["expand"], cfg["stride"], act=True,
                              proj=bp["project"])
    # MBConv
    if cfg["stride"] == 1:
        return mb_block_s1(x, bp, has_res)
    return mb_block_s2(x, bp, cfg["stride"])


def forward(params, x_nchw):
    x_nchw = x_nchw.astype(jnp.float32)
    skips = [x_nchw]                                            # raw input
    xn = normalize_input_nchw(x_nchw)
    skips.append(xn)                                            # normalized input
    x = jnp.transpose(xn, (0, 2, 3, 1)).astype(ACT_DTYPE)       # NCHW -> NHWC
    x = conv3x3_im2col(x, params["stem"], stride=2, act=True)   # features[0]
    for si, (stage_cfg, stage_p) in enumerate(zip(BLOCK_CFGS, params["stages"])):
        for cfg, bp in zip(stage_cfg, stage_p):                 # features[1..6]
            x = _run_block(x, cfg, bp)
        if si < 4:                                              # after features[1..4]
            skips.append(jnp.transpose(x, (0, 3, 1, 2)).astype(jnp.float32))
    out = jnp.transpose(x, (0, 3, 1, 2)).astype(jnp.float32)
    return out, skips


# -----------------------------------------------------------------------------
# Main
# -----------------------------------------------------------------------------

if __name__ == "__main__":
    key = jax.random.PRNGKey(0)
    pkey, xkey = jax.random.split(key)
    params = init_params(pkey)
    x = jax.random.uniform(xkey, (2, 3, 32, 32), jnp.float32)

    out, skips = forward(params, x)
    out = jax.block_until_ready(out)
    skips = [jax.block_until_ready(s) for s in skips]

    expected_skips = [(2, 3, 32, 32), (2, 3, 32, 32), (2, 24, 16, 16),
                      (2, 48, 8, 8), (2, 64, 4, 4), (2, 128, 2, 2)]
    assert out.shape == (2, 256, 1, 1), out.shape
    assert [tuple(s.shape) for s in skips] == expected_skips
    assert bool(jnp.isfinite(out).all())
    print("KERNEL_OK")
</pallas_src>

<mosaic_0001>
module attributes {stable_mosaic.version = 11 : i64} {
  func.func @_norm_kernel(%arg0: memref<6x1024xf32, #tpu.memory_space<vmem>>, %arg1: memref<6x1xf32, #tpu.memory_space<vmem>>, %arg2: memref<6x1xf32, #tpu.memory_space<vmem>>, %arg3: memref<6x1024xf32, #tpu.memory_space<vmem>>) attributes {dimension_semantics = [], scalar_prefetch = 0 : i64, scratch_operands = 0 : i64, tpu.core_type = #tpu.core_type<tc>} {
    %c0 = arith.constant 0 : index
    %c0_0 = arith.constant 0 : index
    %0 = vector.load %arg0[%c0, %c0_0] : memref<6x1024xf32, #tpu.memory_space<vmem>>, vector<6x1024xf32>
    %c0_1 = arith.constant 0 : index
    %c0_2 = arith.constant 0 : index
    %1 = vector.load %arg1[%c0_1, %c0_2] : memref<6x1xf32, #tpu.memory_space<vmem>>, vector<6x1xf32>
    %2 = vector.broadcast %1 : vector<6x1xf32> to vector<6x1024xf32>
    %3 = arith.subf %0, %2 : vector<6x1024xf32>
    %c0_3 = arith.constant 0 : index
    %c0_4 = arith.constant 0 : index
    %4 = vector.load %arg2[%c0_3, %c0_4] : memref<6x1xf32, #tpu.memory_space<vmem>>, vector<6x1xf32>
    %5 = vector.broadcast %4 : vector<6x1xf32> to vector<6x1024xf32>
    %6 = arith.mulf %3, %5 : vector<6x1024xf32>
    %c0_5 = arith.constant 0 : index
    %c0_6 = arith.constant 0 : index
    %7 = vector.load %arg3[%c0_5, %c0_6] : memref<6x1024xf32, #tpu.memory_space<vmem>>, vector<6x1024xf32>
    tpu.vector_store %arg3[%c0_5, %c0_6], %6 {strides = array<i32>} : memref<6x1024xf32, #tpu.memory_space<vmem>>, vector<6x1024xf32>,
    return
  }
}

</mosaic_0001>

<bundles_post_ra>
// kernel: tpu_custom_call.1
= control target key start
LH: loop header
LB: loop body
LE: loop exit
PB: predicated region body
PF: predicated region fallthrough
CT: control target
= control target key end

     0   :  { %8 = vsyncpa [#allocation3], 0  ;;  %s181_s0 = inlined_call_operand.hbm [shape: f32[6,1024], index: 0, kind: input, shape index: {}]   ;;  %s182_s1 = inlined_call_operand.vmem [shape: f32[6,1], index: 1, kind: input, shape index: {}]   ;;  %s183_s2 = inlined_call_operand.vmem [shape: f32[6,1], index: 2, kind: input, shape index: {}]   ;;  %s184_s3 = inlined_call_operand.hbm [shape: f32[6,1024], index: 3, kind: output, shape index: {}]  }
   0x1   :  { %9 = vsyncpa [#allocation4], 0  ;;  %s15_s14 = sshll.u32 %s181_s0, 4  ;;  %s146_s15 = smov [#allocation2]   ;;  %s16_s14 = int_to_ptr.hbm [resolvable:$true] %s15_s14 }
   0x2   :  { %s17_s16 = sshll.u32 %s146_s15, 4  ;;  %s18_s16 = int_to_ptr.vmem [resolvable:$true] %s17_s16 }
   0x3   :  { %20 = dma.hbm_to_vmem [thread:$0]  %s16_s14, 1024, %s18_s16, [#allocation3]  }
   0x4   :  { %142 = dma.done.wait [#allocation3], 1024  }
   0x5   :  { %143 = vsyncadd [#allocation3], 4294966272  ;;  %v147_v0 = vmov 0   ;;  %v37_v1 = vld [vmem:[%s182_s1] sm:$0x3f]  ;;  %s148_s0 = smov [#allocation5]  }
   0x6   :  { %93 = vset.pattern.permute.xlu0 %v147_v0  ;;  %v51_v2 = vld [vmem:[%s183_s2] sm:$0x3f]  ;;  %v30_v5 = vld [vmem:[#allocation2 + $0x8] sm:$0x3f]  ;;  %v31_v6 = vld [vmem:[#allocation2 + $0x10] sm:$0x3f] }
   0x7   :  { %40 = vperm.xlu0 %93, %v37_v1   ;;  %v29_v4 = vld [vmem:[#allocation2] sm:$0x3f]  ;;  %v32_v7 = vld [vmem:[#allocation2 + $0x18] sm:$0x3f]  ;;  %v34_v9 = vld [vmem:[#allocation2 + $0x28] sm:$0x3f] }
   0x8   :  { %v33_v8 = vld [vmem:[#allocation2 + $0x20] sm:$0x3f]  ;;  %v35_v14 = vld [vmem:[#allocation2 + $0x30] sm:$0x3f]  ;;  %v36_v16 = vld [vmem:[#allocation2 + $0x38] sm:$0x3f] }
   0x9   :  { %s78_s1 = sshll.u32 %s148_s0, 4  ;;  %s80_s22 = sshll.u32 %s184_s3, 4  ;;  %s79_s1 = int_to_ptr.vmem [resolvable:$true] %s78_s1  ;;  %s81_s22 = int_to_ptr.hbm [resolvable:$true] %s80_s22 }
   0xf   :  { %54 = vperm.xlu0 %93, %v51_v2  }
  0x79   :  { %v41_v3 = vpop.permute.xlu0 %40 }
  0x7a   :  { %v43_v10 = vsub.f32 %v29_v4, %v41_v3  ;;  %v44_v11 = vsub.f32 %v30_v5, %v41_v3  ;;  %v45_v12 = vsub.f32 %v31_v6, %v41_v3  ;;  %v46_v15 = vsub.f32 %v32_v7, %v41_v3 }
  0x7b   :  { %v47_v17 = vsub.f32 %v33_v8, %v41_v3  ;;  %v48_v21 = vsub.f32 %v34_v9, %v41_v3  ;;  %v49_v23 = vsub.f32 %v35_v14, %v41_v3  ;;  %v50_v25 = vsub.f32 %v36_v16, %v41_v3 }
  0x81   :  { %v55_v13 = vpop.permute.xlu0 %54 }
  0x82   :  { %v57_v18 = vmul.f32 %v55_v13, %v43_v10  ;;  %v58_v19 = vmul.f32 %v55_v13, %v44_v11  ;;  %v59_v20 = vmul.f32 %v55_v13, %v45_v12  ;;  %v60_v22 = vmul.f32 %v55_v13, %v46_v15 }
  0x83   :  { %v61_v24 = vmul.f32 %v55_v13, %v47_v17  ;;  %v62_v26 = vmul.f32 %v55_v13, %v48_v21  ;;  %v63_v27 = vmul.f32 %v55_v13, %v49_v23  ;;  %v64_v28 = vmul.f32 %v55_v13, %v50_v25 }
  0x84   :  { %65 = vst [vmem:[#allocation5] sm:$0x3f] %v57_v18 }
  0x85   :  { %66 = vst [vmem:[#allocation5 + $0x8] sm:$0x3f] %v58_v19 }
  0x86   :  { %67 = vst [vmem:[#allocation5 + $0x10] sm:$0x3f] %v59_v20 }
  0x87   :  { %68 = vst [vmem:[#allocation5 + $0x18] sm:$0x3f] %v60_v22 }
  0x88   :  { %69 = vst [vmem:[#allocation5 + $0x20] sm:$0x3f] %v61_v24 }
  0x89   :  { %70 = vst [vmem:[#allocation5 + $0x28] sm:$0x3f] %v62_v26 }
  0x8a   :  { %71 = vst [vmem:[#allocation5 + $0x30] sm:$0x3f] %v63_v27 }
  0x8b   :  { %72 = vst [vmem:[#allocation5 + $0x38] sm:$0x3f] %v64_v28 }
  0x8c   :  { %83 = dma.vmem_to_hbm [thread:$0]  %s79_s1, 1024, %s81_s22, [#allocation4]  }
  0x8d   :  { %144 = dma.done.wait [#allocation4], 1024  }
  0x8e   :  { %145 = vsyncadd [#allocation4], 4294966272 }
  0x8f   :  { %88 = vsyncpa [#allocation3], 1 }
  0x90   :  { %89 = vsyncpa [#allocation4], 1 }

</bundles_post_ra>
